<compile_context>
chip_gen: v7x
topology: tpu7x:2x2x1
jax: 0.10.0
libtpu: 0.0.40
codegen_flags: <defaults>
</compile_context>

<pallas_src>
import functools

import jax
import jax.numpy as jnp
from jax.experimental import pallas as pl
from jax.experimental.pallas import tpu as pltpu

HIDDEN = 512      # fixed by the module: nn.Linear(d_model, 512)
LN_EPS = 1e-5     # nn.LayerNorm default
LANE = 128
SUBLANE = 8


def _ffn_kernel(x_ref, w1_ref, b1_ref, w2_ref, b2_ref, g_ref, beta_ref, o_ref,
                *, d_model):
    # x tile: (tm, Dp) in the input dtype; keep residual / epilogue in f32.
    x = x_ref[...].astype(jnp.float32)
    xb = x.astype(jnp.bfloat16)

    # Linear(d_model, 512) + bias + ReLU   (bf16 MXU matmul, f32 accumulate)
    h = jnp.dot(xb, w1_ref[...], preferred_element_type=jnp.float32)
    h = jnp.maximum(h + b1_ref[...], 0.0)

    # Linear(512, d_model) + bias
    a = jnp.dot(h.astype(jnp.bfloat16), w2_ref[...],
                preferred_element_type=jnp.float32)
    a = a + b2_ref[...]

    # dropout (eval mode) is identity -> residual add
    y = a + x

    # LayerNorm over the true d_model lanes. Padded lanes of y are exactly 0
    # (weight cols / b2 / x pads are zero), so plain sums / d_model are correct.
    inv_d = 1.0 / d_model
    mu = jnp.sum(y, axis=-1, keepdims=True) * inv_d
    ex2 = jnp.sum(y * y, axis=-1, keepdims=True) * inv_d
    var = ex2 - mu * mu
    yn = (y - mu) * jax.lax.rsqrt(var + LN_EPS)
    o_ref[...] = (yn * g_ref[...] + beta_ref[...]).astype(o_ref.dtype)


@functools.partial(jax.jit, static_argnames=("tm",))
def feed_forward(x, w1, b1, w2, b2, gamma, beta, *, tm=256):
    """x: [B, S, d_model] -> [B, S, d_model]."""
    B, S, D = x.shape
    N = B * S

    # Lane-pad feature dim to a multiple of 128 (lane-dense loads/stores).
    Dp = ((D + LANE - 1) // LANE) * LANE

    # Row tile: multiple of 8 sublanes, capped by a conservative VMEM budget
    # (v7x has only 64 MiB physical / 32 MiB scoped default) and by the token
    # count, so small test shapes don't blow up the grid padding.
    VMEM_BUDGET = 24 * 1024 * 1024
    weight_vmem = 2 * (Dp * HIDDEN * 2) * 2            # W1 + W2, bf16, double-buffered
    per_row = Dp * 4 * 4 + HIDDEN * 6 + Dp * 8         # x/out (dbl-buffered f32) + h + temps
    tm_cap = (VMEM_BUDGET - weight_vmem) // per_row
    n_rounded = ((N + SUBLANE - 1) // SUBLANE) * SUBLANE
    tm_eff = min(tm, max(SUBLANE, tm_cap), n_rounded)
    tm_eff = max(SUBLANE, (tm_eff // SUBLANE) * SUBLANE)

    # Pad token count to a multiple of the row tile (no divisibility assert).
    Np = ((N + tm_eff - 1) // tm_eff) * tm_eff

    # --- prepare operands (padding with zeros keeps padded lanes of y at 0) ---
    x2 = x.reshape(N, D)
    if Dp != D:
        x2 = jnp.pad(x2, ((0, 0), (0, Dp - D)))
    if Np != N:
        x2 = jnp.pad(x2, ((0, Np - N), (0, 0)))

    w1p = w1.astype(jnp.bfloat16)
    w2p = w2.astype(jnp.bfloat16)
    if Dp != D:
        w1p = jnp.pad(w1p, ((0, Dp - D), (0, 0)))
        w2p = jnp.pad(w2p, ((0, 0), (0, Dp - D)))

    b1_2 = b1.reshape(1, HIDDEN).astype(jnp.float32)

    def _pad_vec(v):
        v = v.reshape(1, D).astype(jnp.float32)
        return jnp.pad(v, ((0, 0), (0, Dp - D))) if Dp != D else v

    b2_2 = _pad_vec(b2)
    g_2 = _pad_vec(gamma)
    be_2 = _pad_vec(beta)

    grid = (Np // tm_eff,)
    flops = 4 * N * D * HIDDEN                         # two matmuls, 2*M*K*N each
    bytes_accessed = (N * D * 4 * 2                    # x in + out
                      + 2 * D * HIDDEN * 2             # W1 + W2 (bf16)
                      + (HIDDEN + 3 * D) * 4)          # biases, gamma, beta

    out = pl.pallas_call(
        functools.partial(_ffn_kernel, d_model=D),
        out_shape=jax.ShapeDtypeStruct((Np, Dp), x.dtype),
        grid_spec=pltpu.PrefetchScalarGridSpec(
            num_scalar_prefetch=0,
            grid=grid,
            in_specs=[
                pl.BlockSpec((tm_eff, Dp), lambda i: (i, 0)),     # x rows
                pl.BlockSpec((Dp, HIDDEN), lambda i: (0, 0)),     # W1 (resident)
                pl.BlockSpec((1, HIDDEN), lambda i: (0, 0)),      # b1
                pl.BlockSpec((HIDDEN, Dp), lambda i: (0, 0)),     # W2 (resident)
                pl.BlockSpec((1, Dp), lambda i: (0, 0)),          # b2
                pl.BlockSpec((1, Dp), lambda i: (0, 0)),          # gamma
                pl.BlockSpec((1, Dp), lambda i: (0, 0)),          # beta
            ],
            out_specs=pl.BlockSpec((tm_eff, Dp), lambda i: (i, 0)),
        ),
        compiler_params=pltpu.CompilerParams(
            dimension_semantics=("parallel",),
            vmem_limit_bytes=48 * 1024 * 1024,
        ),
        cost_estimate=pl.CostEstimate(
            flops=flops, transcendentals=0, bytes_accessed=bytes_accessed),
    )(x2, w1p, b1_2, w2p, b2_2, g_2, be_2)

    return out[:N, :D].reshape(B, S, D)


def _reference(x, w1, b1, w2, b2, gamma, beta):
    # precision-matched reference: bf16 matmul operands, f32 accumulate/epilogue
    h = jnp.dot(x.astype(jnp.bfloat16), w1.astype(jnp.bfloat16),
                preferred_element_type=jnp.float32) + b1
    h = jnp.maximum(h, 0.0)
    a = jnp.dot(h.astype(jnp.bfloat16), w2.astype(jnp.bfloat16),
                preferred_element_type=jnp.float32) + b2
    y = a + x
    mu = jnp.mean(y, axis=-1, keepdims=True)
    var = jnp.mean(y * y, axis=-1, keepdims=True) - mu * mu
    return (y - mu) * jax.lax.rsqrt(var + LN_EPS) * gamma + beta


if __name__ == "__main__":
    key = jax.random.PRNGKey(0)
    B, S, D = 2, 8, 32   # d_model = 32

    k = jax.random.split(key, 6)
    x = jax.random.normal(k[0], (B, S, D), dtype=jnp.float32)
    # deterministic synthetic parameters (shapes match nn.Linear / nn.LayerNorm)
    w1 = jax.random.normal(k[1], (D, HIDDEN), dtype=jnp.float32) * 0.05
    b1 = jax.random.normal(k[2], (HIDDEN,), dtype=jnp.float32) * 0.01
    w2 = jax.random.normal(k[3], (HIDDEN, D), dtype=jnp.float32) * 0.05
    b2 = jax.random.normal(k[4], (D,), dtype=jnp.float32) * 0.01
    gamma = jnp.ones((D,), dtype=jnp.float32)
    beta = jnp.zeros((D,), dtype=jnp.float32)

    out = jax.block_until_ready(feed_forward(x, w1, b1, w2, b2, gamma, beta))
    ref = _reference(x, w1, b1, w2, b2, gamma, beta)

    assert out.shape == (B, S, D)
    err = float(jnp.max(jnp.abs(out - ref)))
    assert jnp.allclose(out, ref, atol=2e-3, rtol=2e-3), err

    print("KERNEL_OK")
</pallas_src>

<mosaic_0001>
module attributes {stable_mosaic.version = 11 : i64} {
  func.func @_ffn_kernel(%arg0: i32, %arg1: memref<16x128xf32, #tpu.memory_space<vmem>>, %arg2: memref<128x512xbf16, #tpu.memory_space<vmem>>, %arg3: memref<1x512xf32, #tpu.memory_space<vmem>>, %arg4: memref<512x128xbf16, #tpu.memory_space<vmem>>, %arg5: memref<1x128xf32, #tpu.memory_space<vmem>>, %arg6: memref<1x128xf32, #tpu.memory_space<vmem>>, %arg7: memref<1x128xf32, #tpu.memory_space<vmem>>, %arg8: memref<16x128xf32, #tpu.memory_space<vmem>>) attributes {dimension_semantics = [#tpu.dimension_semantics<parallel>], iteration_bounds = array<i64: 1>, scalar_prefetch = 0 : i64, scratch_operands = 0 : i64, tpu.core_type = #tpu.core_type<tc>, window_params = [{transform_indices = @transform_0, window_bounds = array<i64: 16, 128>}, {pipeline_mode = #tpu.pipeline_mode<synchronous>, transform_indices = @transform_1, window_bounds = array<i64: 128, 512>}, {pipeline_mode = #tpu.pipeline_mode<synchronous>, transform_indices = @transform_2, window_bounds = array<i64: 1, 512>}, {pipeline_mode = #tpu.pipeline_mode<synchronous>, transform_indices = @transform_3, window_bounds = array<i64: 512, 128>}, {pipeline_mode = #tpu.pipeline_mode<synchronous>, transform_indices = @transform_4, window_bounds = array<i64: 1, 128>}, {pipeline_mode = #tpu.pipeline_mode<synchronous>, transform_indices = @transform_5, window_bounds = array<i64: 1, 128>}, {pipeline_mode = #tpu.pipeline_mode<synchronous>, transform_indices = @transform_6, window_bounds = array<i64: 1, 128>}, {transform_indices = @transform_7, window_bounds = array<i64: 16, 128>}]} {
    %c0 = arith.constant 0 : index
    %c0_0 = arith.constant 0 : index
    %0 = vector.load %arg1[%c0, %c0_0] : memref<16x128xf32, #tpu.memory_space<vmem>>, vector<16x128xf32>
    %1 = arith.truncf %0 : vector<16x128xf32> to vector<16x128xbf16>
    %c0_1 = arith.constant 0 : index
    %c0_2 = arith.constant 0 : index
    %2 = vector.load %arg2[%c0_1, %c0_2] : memref<128x512xbf16, #tpu.memory_space<vmem>>, vector<128x512xbf16>
    %cst = arith.constant dense<0.000000e+00> : vector<16x512xf32>
    %3 = tpu.matmul %1, %2, %cst {dimension_numbers = #tpu.dot_dimension_numbers<[1], [0], [0], [1], [0, 0, 1, 1], [], []>} : vector<16x128xbf16>, vector<128x512xbf16>, vector<16x512xf32> -> vector<16x512xf32>
    %c0_3 = arith.constant 0 : index
    %c0_4 = arith.constant 0 : index
    %4 = vector.load %arg3[%c0_3, %c0_4] : memref<1x512xf32, #tpu.memory_space<vmem>>, vector<1x512xf32>
    %5 = vector.broadcast %4 : vector<1x512xf32> to vector<16x512xf32>
    %6 = arith.addf %3, %5 : vector<16x512xf32>
    %cst_5 = arith.constant 0.000000e+00 : f32
    %7 = vector.broadcast %cst_5 : f32 to vector<16x512xf32>
    %8 = arith.maximumf %6, %7 : vector<16x512xf32>
    %9 = arith.truncf %8 : vector<16x512xf32> to vector<16x512xbf16>
    %c0_6 = arith.constant 0 : index
    %c0_7 = arith.constant 0 : index
    %10 = vector.load %arg4[%c0_6, %c0_7] : memref<512x128xbf16, #tpu.memory_space<vmem>>, vector<512x128xbf16>
    %cst_8 = arith.constant dense<0.000000e+00> : vector<16x128xf32>
    %11 = tpu.matmul %9, %10, %cst_8 {dimension_numbers = #tpu.dot_dimension_numbers<[1], [0], [0], [1], [0, 0, 1, 1], [], []>} : vector<16x512xbf16>, vector<512x128xbf16>, vector<16x128xf32> -> vector<16x128xf32>
    %c0_9 = arith.constant 0 : index
    %c0_10 = arith.constant 0 : index
    %12 = vector.load %arg5[%c0_9, %c0_10] : memref<1x128xf32, #tpu.memory_space<vmem>>, vector<1x128xf32>
    %13 = vector.broadcast %12 : vector<1x128xf32> to vector<16x128xf32>
    %14 = arith.addf %11, %13 : vector<16x128xf32>
    %15 = arith.addf %14, %0 : vector<16x128xf32>
    %cst_11 = arith.constant dense<0.000000e+00> : vector<16xf32>
    %16 = vector.multi_reduction <add>, %15, %cst_11 [1] : vector<16x128xf32> to vector<16xf32>
    %17 = vector.shape_cast %16 : vector<16xf32> to vector<16x1xf32>
    %cst_12 = arith.constant 3.125000e-02 : f32
    %18 = vector.broadcast %cst_12 : f32 to vector<16x1xf32>
    %19 = arith.mulf %17, %18 : vector<16x1xf32>
    %20 = arith.mulf %15, %15 : vector<16x128xf32>
    %cst_13 = arith.constant dense<0.000000e+00> : vector<16xf32>
    %21 = vector.multi_reduction <add>, %20, %cst_13 [1] : vector<16x128xf32> to vector<16xf32>
    %22 = vector.shape_cast %21 : vector<16xf32> to vector<16x1xf32>
    %cst_14 = arith.constant 3.125000e-02 : f32
    %23 = vector.broadcast %cst_14 : f32 to vector<16x1xf32>
    %24 = arith.mulf %22, %23 : vector<16x1xf32>
    %25 = arith.mulf %19, %19 : vector<16x1xf32>
    %26 = arith.subf %24, %25 : vector<16x1xf32>
    %27 = vector.broadcast %19 : vector<16x1xf32> to vector<16x128xf32>
    %28 = arith.subf %15, %27 : vector<16x128xf32>
    %cst_15 = arith.constant 9.99999974E-6 : f32
    %29 = vector.broadcast %cst_15 : f32 to vector<16x1xf32>
    %30 = arith.addf %26, %29 : vector<16x1xf32>
    %31 = math.rsqrt %30 : vector<16x1xf32>
    %32 = vector.broadcast %31 : vector<16x1xf32> to vector<16x128xf32>
    %33 = arith.mulf %28, %32 : vector<16x128xf32>
    %c0_16 = arith.constant 0 : index
    %c0_17 = arith.constant 0 : index
    %34 = vector.load %arg6[%c0_16, %c0_17] : memref<1x128xf32, #tpu.memory_space<vmem>>, vector<1x128xf32>
    %35 = vector.broadcast %34 : vector<1x128xf32> to vector<16x128xf32>
    %36 = arith.mulf %33, %35 : vector<16x128xf32>
    %c0_18 = arith.constant 0 : index
    %c0_19 = arith.constant 0 : index
    %37 = vector.load %arg7[%c0_18, %c0_19] : memref<1x128xf32, #tpu.memory_space<vmem>>, vector<1x128xf32>
    %38 = vector.broadcast %37 : vector<1x128xf32> to vector<16x128xf32>
    %39 = arith.addf %36, %38 : vector<16x128xf32>
    %c0_20 = arith.constant 0 : index
    %c0_21 = arith.constant 0 : index
    %40 = vector.load %arg8[%c0_20, %c0_21] : memref<16x128xf32, #tpu.memory_space<vmem>>, vector<16x128xf32>
    tpu.vector_store %arg8[%c0_20, %c0_21], %39 {strides = array<i32>} : memref<16x128xf32, #tpu.memory_space<vmem>>, vector<16x128xf32>,
    return
  }
  func.func @transform_0(%arg0: i32) -> (i32, i32) {
    %c0_i32 = arith.constant 0 : i32
    %c0_i32_0 = arith.constant 0 : i32
    return %arg0, %c0_i32 : i32, i32
  }
  func.func @transform_1(%arg0: i32) -> (i32, i32) {
    %c0_i32 = arith.constant 0 : i32
    %c0_i32_0 = arith.constant 0 : i32
    %c0_i32_1 = arith.constant 0 : i32
    return %c0_i32, %c0_i32_0 : i32, i32
  }
  func.func @transform_2(%arg0: i32) -> (i32, i32) {
    %c0_i32 = arith.constant 0 : i32
    %c0_i32_0 = arith.constant 0 : i32
    %c0_i32_1 = arith.constant 0 : i32
    return %c0_i32, %c0_i32_0 : i32, i32
  }
  func.func @transform_3(%arg0: i32) -> (i32, i32) {
    %c0_i32 = arith.constant 0 : i32
    %c0_i32_0 = arith.constant 0 : i32
    %c0_i32_1 = arith.constant 0 : i32
    return %c0_i32, %c0_i32_0 : i32, i32
  }
  func.func @transform_4(%arg0: i32) -> (i32, i32) {
    %c0_i32 = arith.constant 0 : i32
    %c0_i32_0 = arith.constant 0 : i32
    %c0_i32_1 = arith.constant 0 : i32
    return %c0_i32, %c0_i32_0 : i32, i32
  }
  func.func @transform_5(%arg0: i32) -> (i32, i32) {
    %c0_i32 = arith.constant 0 : i32
    %c0_i32_0 = arith.constant 0 : i32
    %c0_i32_1 = arith.constant 0 : i32
    return %c0_i32, %c0_i32_0 : i32, i32
  }
  func.func @transform_6(%arg0: i32) -> (i32, i32) {
    %c0_i32 = arith.constant 0 : i32
    %c0_i32_0 = arith.constant 0 : i32
    %c0_i32_1 = arith.constant 0 : i32
    return %c0_i32, %c0_i32_0 : i32, i32
  }
  func.func @transform_7(%arg0: i32) -> (i32, i32) {
    %c0_i32 = arith.constant 0 : i32
    %c0_i32_0 = arith.constant 0 : i32
    return %arg0, %c0_i32 : i32, i32
  }
}

</mosaic_0001>

<bundles_post_ra>
// kernel: feed_forward.1
= control target key start
LH: loop header
LB: loop body
LE: loop exit
PB: predicated region body
PF: predicated region fallthrough
CT: control target
= control target key end

     0   :  { %v935_v1 = vmov 0   ;;  %s1200_s1 = inlined_call_operand.vmem [shape: bf16[128,512], index: 1, kind: input, shape index: {}]   ;;  %s1201_s3 = inlined_call_operand.vmem [shape: bf16[512,128], index: 3, kind: input, shape index: {}]   ;;  %s1202_s0 = inlined_call_operand.vmem [shape: f32[16,128], index: 0, kind: input, shape index: {}]   ;;  %s1203_s2 = inlined_call_operand.vmem [shape: f32[1,512], index: 2, kind: input, shape index: {}]   ;;  %s1204_s4 = inlined_call_operand.vmem [shape: f32[1,128], index: 4, kind: input, shape index: {}]   ;;  %s1205_s5 = inlined_call_operand.vmem [shape: f32[1,128], index: 5, kind: input, shape index: {}]   ;;  %s1206_s6 = inlined_call_operand.vmem [shape: f32[1,128], index: 6, kind: input, shape index: {}]   ;;  %s1207_s7 = inlined_call_operand.vmem [shape: f32[16,128], index: 7, kind: output, shape index: {}]  }
   0x1   :  { %v851_v0 = vld [vmem:[%s1200_s1 + $0x4] ss:$16 sps:$4 sm:$0xff]   ;;  %276 = vmatprep.mubr.bf16.mxu0 %v935_v1  ;;  %319 = vmatprep.mubr.bf16.mxu1 %v935_v1  ;;  %v853_v2 = vld [vmem:[%s1200_s1 + $0xc] ss:$16 sps:$4 sm:$0xff]   ;;  %v855_v3 = vld [vmem:[%s1200_s1] ss:$16 sps:$4 sm:$0xff]  }
   0x2   :  { %244 = vmatprep.subr.bf16.mxu0 %v851_v0  ;;  %v856_v4 = vld [vmem:[%s1200_s1 + $0x8] ss:$16 sps:$4 sm:$0xff]   ;;  %287 = vmatprep.subr.bf16.mxu1 %v853_v2  ;;  %v857_v5 = vld [vmem:[%s1200_s1 + $0x24] ss:$16 sps:$4 sm:$0xff]   ;;  %v859_v6 = vld [vmem:[%s1200_s1 + $0x2c] ss:$16 sps:$4 sm:$0xff]  }
   0x3   :  { %245 = vmatpush1.bf16.msra.mxu0 %v855_v3  ;;  %288 = vmatpush1.bf16.msra.mxu1 %v856_v4  ;;  %v861_v7 = vld [vmem:[%s1200_s1 + $0x20] ss:$16 sps:$4 sm:$0xff]   ;;  %v862_v8 = vld [vmem:[%s1200_s1 + $0x28] ss:$16 sps:$4 sm:$0xff]   ;;  %v863_v9 = vld [vmem:[%s1200_s1 + $0x44] ss:$16 sps:$4 sm:$0xff]   ;;  %v64_v4 = vlaneseq }
   0x4   :  { %246 = vmatprep.subr.bf16.mxu0 %v857_v5  ;;  %289 = vmatprep.subr.bf16.mxu1 %v859_v6  ;;  %v865_v10 = vld [vmem:[%s1200_s1 + $0x4c] ss:$16 sps:$4 sm:$0xff]   ;;  %v867_v11 = vld [vmem:[%s1200_s1 + $0x40] ss:$16 sps:$4 sm:$0xff]   ;;  %v868_v12 = vld [vmem:[%s1200_s1 + $0x48] ss:$16 sps:$4 sm:$0xff]  }
   0x5   :  { %v869_v13 = vld [vmem:[%s1200_s1 + $0x64] ss:$16 sps:$4 sm:$0xff]   ;;  %v871_v14 = vld [vmem:[%s1200_s1 + $0x6c] ss:$16 sps:$4 sm:$0xff]   ;;  %v873_v15 = vld [vmem:[%s1200_s1 + $0x60] ss:$16 sps:$4 sm:$0xff]  }
   0x6   :  { %v874_v16 = vld [vmem:[%s1200_s1 + $0x68] ss:$16 sps:$4 sm:$0xff]   ;;  %v875_v17 = vld [vmem:[%s1200_s1 + $0x84] ss:$16 sps:$4 sm:$0xff]   ;;  %v877_v18 = vld [vmem:[%s1200_s1 + $0x8c] ss:$16 sps:$4 sm:$0xff]  }
   0x7   :  { %247 = vmatpush1.bf16.msra.mxu0 %v861_v7  ;;  %290 = vmatpush1.bf16.msra.mxu1 %v862_v8  ;;  %v879_v19 = vld [vmem:[%s1200_s1 + $0x80] ss:$16 sps:$4 sm:$0xff]   ;;  %v880_v20 = vld [vmem:[%s1200_s1 + $0x88] ss:$16 sps:$4 sm:$0xff]   ;;  %v881_v21 = vld [vmem:[%s1200_s1 + $0xa4] ss:$16 sps:$4 sm:$0xff]  }
   0x8   :  { %248 = vmatprep.subr.bf16.mxu0 %v863_v9  ;;  %291 = vmatprep.subr.bf16.mxu1 %v865_v10  ;;  %v883_v22 = vld [vmem:[%s1200_s1 + $0xac] ss:$16 sps:$4 sm:$0xff]   ;;  %v885_v23 = vld [vmem:[%s1200_s1 + $0xa0] ss:$16 sps:$4 sm:$0xff]   ;;  %v886_v24 = vld [vmem:[%s1200_s1 + $0xa8] ss:$16 sps:$4 sm:$0xff]  }
   0x9   :  { %v887_v25 = vld [vmem:[%s1200_s1 + $0xc4] ss:$16 sps:$4 sm:$0xff]   ;;  %v889_v26 = vld [vmem:[%s1200_s1 + $0xcc] ss:$16 sps:$4 sm:$0xff]   ;;  %v891_v27 = vld [vmem:[%s1200_s1 + $0xc0] ss:$16 sps:$4 sm:$0xff]  }
   0xa   :  { %v892_v28 = vld [vmem:[%s1200_s1 + $0xc8] ss:$16 sps:$4 sm:$0xff]   ;;  %v893_v29 = vld [vmem:[%s1200_s1 + $0xe4] ss:$16 sps:$4 sm:$0xff]   ;;  %v895_v30 = vld [vmem:[%s1200_s1 + $0xec] ss:$16 sps:$4 sm:$0xff]  }
   0xb   :  { %249 = vmatpush1.bf16.msra.mxu0 %v867_v11  ;;  %292 = vmatpush1.bf16.msra.mxu1 %v868_v12  ;;  %v897_v31 = vld [vmem:[%s1200_s1 + $0xe0] ss:$16 sps:$4 sm:$0xff]   ;;  %v898_v32 = vld [vmem:[%s1200_s1 + $0xe8] ss:$16 sps:$4 sm:$0xff]   ;;  %v65_v5 = vshrl.u32 %v64_v4, 7 }
   0xc   :  { %250 = vmatprep.subr.bf16.mxu0 %v869_v13  ;;  %293 = vmatprep.subr.bf16.mxu1 %v871_v14  ;;  %v1075_v33 = vld [vmem:[%s1202_s0] sm:$0xff]  ;;  %v1080_v34 = vld [vmem:[%s1202_s0 + $0x8] sm:$0xff]  ;;  %v907_v44 = vld [vmem:[%s1201_s3 + $0x50] sm:$0xff]  }
   0xd   :  { %v899_v35 = vld [vmem:[%s1201_s3 + $0x40] sm:$0xff]   ;;  %v29_v38 = vpack.c.bf16 %v1080_v34, %v1075_v33  ;;  %v903_v40 = vld [vmem:[%s1201_s3 + $0x48] sm:$0xff]   ;;  %v908_v45 = vld [vmem:[%s1201_s3 + $0xd0] sm:$0xff]   ;;  %v66_v6 = vsub.s32 0, %v65_v5  ;;  %v74_v7 = vsub.s32 2, %v65_v5  ;;  %v70_v9 = vsub.s32 1, %v65_v5 }
   0xe   :  { %v900_v36 = vld [vmem:[%s1201_s3 + $0xc0] sm:$0xff]   ;;  %v904_v41 = vld [vmem:[%s1201_s3 + $0xc8] sm:$0xff]   ;;  %v909_v46 = vld [vmem:[%s1201_s3 + $0x10] sm:$0xff]   ;;  %v78_v10 = vsub.s32 3, %v65_v5 }
   0xf   :  { %251 = vmatpush1.bf16.msra.mxu0 %v873_v15  ;;  %294 = vmatpush1.bf16.msra.mxu1 %v874_v16  ;;  %v901_v37 = vld [vmem:[%s1201_s3] sm:$0xff]   ;;  %v905_v42 = vld [vmem:[%s1201_s3 + $0x8] sm:$0xff]   ;;  %v910_v47 = vld [vmem:[%s1201_s3 + $0x90] sm:$0xff]  }
  0x10   :  { %252 = vmatprep.subr.bf16.mxu0 %v875_v17  ;;  %295 = vmatprep.subr.bf16.mxu1 %v877_v18  ;;  %v902_v39 = vld [vmem:[%s1201_s3 + $0x80] sm:$0xff]   ;;  %v906_v43 = vld [vmem:[%s1201_s3 + $0x88] sm:$0xff]   ;;  %v911_v48 = vld [vmem:[%s1201_s3 + $0x58] sm:$0xff]  }
  0x11   :  { %v912_v49 = vld [vmem:[%s1201_s3 + $0xd8] sm:$0xff]   ;;  %v915_v52 = vld [vmem:[%s1201_s3 + $0x60] sm:$0xff]   ;;  %v919_v56 = vld [vmem:[%s1201_s3 + $0x68] sm:$0xff]  }
  0x12   :  { %v913_v50 = vld [vmem:[%s1201_s3 + $0x18] sm:$0xff]   ;;  %v916_v53 = vld [vmem:[%s1201_s3 + $0xe0] sm:$0xff]   ;;  %v920_v57 = vld [vmem:[%s1201_s3 + $0xe8] sm:$0xff]  }
  0x13   :  { %253 = vmatpush1.bf16.msra.mxu0 %v879_v19  ;;  %296 = vmatpush1.bf16.msra.mxu1 %v880_v20  ;;  %v914_v51 = vld [vmem:[%s1201_s3 + $0x98] sm:$0xff]   ;;  %v917_v54 = vld [vmem:[%s1201_s3 + $0x20] sm:$0xff]   ;;  %v921_v58 = vld [vmem:[%s1201_s3 + $0x28] sm:$0xff]  }
  0x14   :  { %254 = vmatprep.subr.bf16.mxu0 %v881_v21  ;;  %297 = vmatprep.subr.bf16.mxu1 %v883_v22  ;;  %v918_v55 = vld [vmem:[%s1201_s3 + $0xa0] sm:$0xff]   ;;  %v922_v59 = vld [vmem:[%s1201_s3 + $0xa8] sm:$0xff]   ;;  %v923_v60 = vld [vmem:[%s1201_s3 + $0x70] sm:$0xff]  }
  0x15   :  { %v924_v61 = vld [vmem:[%s1201_s3 + $0xf0] sm:$0xff]   ;;  %v927_v0 = vld [vmem:[%s1201_s3 + $0x78] sm:$0xff]   ;;  %v62_v8 = vld [vmem:[%s1203_s2] sm:$0xf] }
  0x16   :  { %v925_v62 = vld [vmem:[%s1201_s3 + $0x30] sm:$0xff]   ;;  %v928_v1 = vld [vmem:[%s1201_s3 + $0xf8] sm:$0xff]   ;;  %v67_v11 = vrot.slane %v62_v8, %v66_v6  ;;  %v75_v12 = vrot.slane %v62_v8, %v74_v7  ;;  %v71_v13 = vrot.slane %v62_v8, %v70_v9  ;;  %v79_v14 = vrot.slane %v62_v8, %v78_v10 }
  0x17   :  { %255 = vmatpush1.bf16.msra.mxu0 %v885_v23  ;;  %298 = vmatpush1.bf16.msra.mxu1 %v886_v24  ;;  %v926_v63 = vld [vmem:[%s1201_s3 + $0xb0] sm:$0xff]   ;;  %v929_v2 = vld [vmem:[%s1201_s3 + $0x38] sm:$0xff]  }
  0x18   :  { %256 = vmatprep.subr.bf16.mxu0 %v887_v25  ;;  %299 = vmatprep.subr.bf16.mxu1 %v889_v26  ;;  %v930_v3 = vld [vmem:[%s1201_s3 + $0xb8] sm:$0xff]  }
  0x1b   :  { %257 = vmatpush1.bf16.msra.mxu0 %v891_v27  ;;  %300 = vmatpush1.bf16.msra.mxu1 %v892_v28 }
  0x1c   :  { %258 = vmatprep.subr.bf16.mxu0 %v893_v29  ;;  %301 = vmatprep.subr.bf16.mxu1 %v895_v30 }
  0x1f   :  { %259 = vmatpush1.bf16.msra.mxu0 %v897_v31  ;;  %302 = vmatpush1.bf16.msra.mxu1 %v898_v32 }
  0x20   :  { %806 = vmatprep.subr.bf16.mxu0 %v899_v35  ;;  %828 = vmatprep.subr.bf16.mxu1 %v900_v36 }
  0x22   :  { %277 = vmatmul.mubr.bf16.vlgmr.msra.gmra.mrb[0].mxu0 %v29_v38  ;;  %320 = vmatmul.mubr.bf16.vlgmr.msra.gmra.mrb[0].mxu1 %v29_v38 }
  0x23   :  { %807 = vmatpush3.bf16.msra.mxu0 %v901_v37  ;;  %829 = vmatpush3.bf16.msra.mxu1 %v902_v39 }
  0x24   :  { %808 = vmatprep.subr.bf16.mxu0 %v903_v40  ;;  %830 = vmatprep.subr.bf16.mxu1 %v904_v41 }
  0x27   :  { %809 = vmatpush3.bf16.msra.mxu0 %v905_v42  ;;  %831 = vmatpush3.bf16.msra.mxu1 %v906_v43 }
  0x28   :  { %810 = vmatprep.subr.bf16.mxu0 %v907_v44  ;;  %832 = vmatprep.subr.bf16.mxu1 %v908_v45 }
  0x2b   :  { %811 = vmatpush3.bf16.msra.mxu0 %v909_v46  ;;  %833 = vmatpush3.bf16.msra.mxu1 %v910_v47  ;;  %v771_v47 = vld [vmem:[%s1204_s4] ss:$0 sm:$0xff] }
  0x2c   :  { %812 = vmatprep.subr.bf16.mxu0 %v911_v48  ;;  %834 = vmatprep.subr.bf16.mxu1 %v912_v49 }
  0x2f   :  { %813 = vmatpush3.bf16.msra.mxu0 %v913_v50  ;;  %835 = vmatpush3.bf16.msra.mxu1 %v914_v51 }
  0x30   :  { %814 = vmatprep.subr.bf16.mxu0 %v915_v52  ;;  %836 = vmatprep.subr.bf16.mxu1 %v916_v53 }
  0x33   :  { %815 = vmatpush3.bf16.msra.mxu0 %v917_v54  ;;  %837 = vmatpush3.bf16.msra.mxu1 %v918_v55 }
  0x34   :  { %816 = vmatprep.subr.bf16.mxu0 %v919_v56  ;;  %838 = vmatprep.subr.bf16.mxu1 %v920_v57 }
  0x37   :  { %817 = vmatpush3.bf16.msra.mxu0 %v921_v58  ;;  %839 = vmatpush3.bf16.msra.mxu1 %v922_v59 }
  0x38   :  { %818 = vmatprep.subr.bf16.mxu0 %v923_v60  ;;  %840 = vmatprep.subr.bf16.mxu1 %v924_v61 }
  0x3b   :  { %819 = vmatpush3.bf16.msra.mxu0 %v925_v62  ;;  %841 = vmatpush3.bf16.msra.mxu1 %v926_v63 }
  0x3c   :  { %820 = vmatprep.subr.bf16.mxu0 %v927_v0  ;;  %842 = vmatprep.subr.bf16.mxu1 %v928_v1 }
  0x3f   :  { %821 = vmatpush3.bf16.msra.mxu0 %v929_v2  ;;  %843 = vmatpush3.bf16.msra.mxu1 %v930_v3 }
  0xf5   :  { %v278_v15 = vpop.f32.mrb[0].mxu0  ;;  %v321_v16 = vpop.f32.mrb[0].mxu1 }
  0xf6   :  { %v279_v17 = vadd.f32 %v278_v15, %v67_v11  ;;  %v322_v18 = vadd.f32 %v321_v16, %v75_v12  ;;  %v280_v19 = vpop.f32.mrb[1].mxu0  ;;  %v323_v20 = vpop.f32.mrb[1].mxu1  ;;  %v804_v16 = vld [vmem:[%s1205_s5] ss:$0 sm:$0xff] }
  0xf7   :  { %v281_v21 = vadd.f32 %v280_v19, %v71_v13  ;;  %v324_v22 = vadd.f32 %v323_v20, %v79_v14  ;;  %v282_v23 = vpop.f32.mrb[2].mxu0  ;;  %v325_v24 = vpop.f32.mrb[2].mxu1 }
  0xf8   :  { %v332_v25 = vmax.f32 %v322_v18, 0.0  ;;  %v283_v26 = vadd.f32 %v282_v23, %v67_v11  ;;  %v326_v27 = vadd.f32 %v325_v24, %v75_v12  ;;  %v284_v28 = vpop.f32.mrb[3].mxu0  ;;  %v327_v29 = vpop.f32.mrb[3].mxu1  ;;  %v330_v35 = vmax.f32 %v279_v17, 0.0  ;;  %v805_v18 = vld [vmem:[%s1206_s6] ss:$0 sm:$0xff] }
  0xf9   :  { %v333_v30 = vmax.f32 %v324_v22, 0.0  ;;  %v285_v31 = vadd.f32 %v284_v28, %v71_v13  ;;  %v328_v32 = vadd.f32 %v327_v29, %v79_v14  ;;  %v331_v38 = vmax.f32 %v281_v21, 0.0 }
  0xfa   :  { %v334_v36 = vmax.f32 %v283_v26, 0.0  ;;  %v336_v37 = vmax.f32 %v326_v27, 0.0 }
  0xfb   :  { %v335_v39 = vmax.f32 %v285_v31, 0.0  ;;  %v337_v40 = vmax.f32 %v328_v32, 0.0 }
  0xfc   :  { %v338_v41 = vpack.c.bf16 %v334_v36, %v330_v35  ;;  %v340_v42 = vpack.c.bf16 %v336_v37, %v332_v25 }
  0xfd   :  { %v339_v43 = vpack.c.bf16 %v335_v39, %v331_v38  ;;  %v341_v44 = vpack.c.bf16 %v337_v40, %v333_v30 }
  0xff   :  { %637 = vmatprep.mubr.bf16.mxu0 %v339_v43  ;;  %678 = vmatprep.mubr.bf16.mxu1 %v341_v44 }
 0x100   :  { %638 = vmatmul.mubr.bf16.vlgmr.msra.gmra.mrb[4].mxu0 %v338_v41  ;;  %679 = vmatmul.mubr.bf16.vlgmr.msra.gmra.mrb[4].mxu1 %v340_v42 }
 0x1d3   :  { %v822_v45 = vpop.f32.mrb[4].mxu0  ;;  %v844_v46 = vpop.f32.mrb[4].mxu1 }
 0x1d4   :  { %v823_v48 = vpop.f32.mrb[5].mxu0  ;;  %v845_v49 = vpop.f32.mrb[5].mxu1 }
 0x1d5   :  { %v824_v50 = vadd.f32 %v823_v48, %v822_v45  ;;  %v846_v51 = vadd.f32 %v845_v49, %v844_v46  ;;  %v825_v52 = vpop.f32.mrb[6].mxu0  ;;  %v847_v53 = vpop.f32.mrb[6].mxu1 }
 0x1d6   :  { %v826_v54 = vpop.f32.mrb[7].mxu0  ;;  %v848_v55 = vpop.f32.mrb[7].mxu1 }
 0x1d7   :  { %v640_v56 = vadd.f32 %v824_v50, %v771_v47  ;;  %v827_v57 = vadd.f32 %v826_v54, %v825_v52  ;;  %v849_v58 = vadd.f32 %v848_v55, %v847_v53 }
 0x1d9   :  { %v681_v59 = vadd.f32 %v846_v51, %v640_v56  ;;  %v643_v60 = vadd.f32 %v827_v57, %v771_v47 }
 0x1db   :  { %v684_v61 = vadd.f32 %v849_v58, %v643_v60  ;;  %v687_v62 = vadd.f32 %v681_v59, %v1075_v33 }
 0x1dd   :  { %689 = vadd.xlane.f32.xlu0 %v687_v62  ;;  %v695_v63 = vmul.f32 %v687_v62, %v687_v62  ;;  %v688_v0 = vadd.f32 %v684_v61, %v1080_v34 }
 0x1df   :  { %697 = vadd.xlane.f32.xlu1 %v695_v63  ;;  %v696_v1 = vmul.f32 %v688_v0, %v688_v0 }
 0x1e1   :  { %691 = vadd.xlane.f32.xlu0 %v688_v0 }
 0x1e3   :  { %699 = vadd.xlane.f32.xlu1 %v696_v1 }
 0x26a   :  { %v690_v2 = vpop.xlane.xlu0 %689 }
 0x26b   :  { %v693_v3 = vmul.f32 0.03125, %v690_v2 }
 0x26c   :  { %v698_v4 = vpop.xlane.xlu1 %697 }
 0x26d   :  { %v703_v5 = vmul.f32 %v693_v3, %v693_v3  ;;  %v701_v6 = vmul.f32 0.03125, %v698_v4  ;;  %v707_v34 = vsub.f32 %v687_v62, %v693_v3 }
 0x26e   :  { %v692_v7 = vpop.xlane.xlu0 %691 }
 0x26f   :  { %v705_v8 = vsub.f32 %v701_v6, %v703_v5  ;;  %v694_v9 = vmul.f32 0.03125, %v692_v7 }
 0x270   :  { %v700_v10 = vpop.xlane.xlu1 %699 }
 0x271   :  { %v709_v11 = vadd.f32 1e-05, %v705_v8  ;;  %v704_v12 = vmul.f32 %v694_v9, %v694_v9  ;;  %v702_v33 = vmul.f32 0.03125, %v700_v10  ;;  %v708_v20 = vsub.f32 %v688_v0, %v694_v9 }
 0x273   :  { %931 = vrsqrt.f32 %v709_v11  ;;  %v706_v13 = vsub.f32 %v702_v33, %v704_v12 }
 0x275   :  { %v710_v14 = vadd.f32 1e-05, %v706_v13 }
 0x277   :  { %933 = vrsqrt.f32 %v710_v14 }
 0x27d   :  { %v932_v15 = vpop.eup %931 }
 0x27e   :  { %v713_v17 = vmul.f32 %v932_v15, %v707_v34 }
 0x280   :  { %v722_v19 = vmul.f32 %v804_v16, %v713_v17 }
 0x281   :  { %v934_v21 = vpop.eup %933 }
 0x282   :  { %v731_v22 = vadd.f32 %v805_v18, %v722_v19  ;;  %v714_v23 = vmul.f32 %v934_v21, %v708_v20 }
 0x284   :  { %733 = vst [vmem:[%s1207_s7] sm:$0xff] %v731_v22  ;;  %v723_v24 = vmul.f32 %v804_v16, %v714_v23 }
 0x286   :  { %v732_v25 = vadd.f32 %v805_v18, %v723_v24 }
 0x288   :  { %734 = vst [vmem:[%s1207_s7 + $0x8] sm:$0xff] %v732_v25 }

</bundles_post_ra>
